<compile_context>
chip_gen: v7x
topology: tpu7x:2x2x1
jax: 0.10.0
libtpu: 0.0.40
codegen_flags: <defaults>
</compile_context>

<pallas_src>
import jax
import jax.numpy as jnp
from jax.experimental import pallas as pl
from jax.experimental.pallas import tpu as pltpu


def _round_up(a: int, b: int) -> int:
    return (a + b - 1) // b * b


def deepconv1d_kernel(x_ref, w1_ref, b1_ref, w2_ref, b2_ref, o_ref):
    """Row-major math on one token tile. x_ref: (tm, nx) f32, weights resident."""
    x = x_ref[...].astype(w1_ref.dtype)                           # in-kernel cast
    # h = x @ w1 + b1  -- MXU with f32 accumulation, f32 epilogue.
    h = jnp.dot(x, w1_ref[...], preferred_element_type=jnp.float32)
    h = h + b1_ref[...]                                           # (tm, nf) f32
    # ReLU branch feeds the second matmul; residual uses the pre-ReLU h.
    r = jnp.maximum(h, 0.0).astype(w2_ref.dtype)                  # back to MXU dtype
    y = jnp.dot(r, w2_ref[...], preferred_element_type=jnp.float32)
    y = y + b2_ref[...]
    o_ref[...] = (y + h).astype(o_ref.dtype)                      # f32 store


def deepconv1d(x, w1, b1, w2, b2, *, tm=8192, matmul_dtype=jnp.bfloat16):
    """DeepConv1D forward. x: (..., nx) f32 -> (..., nf) f32."""
    nx = x.shape[-1]
    nf = w1.shape[1]
    size_out = x.shape[:-1] + (nf,)

    xm = x.reshape(-1, nx)          # row-major f32, fed directly (no extra HBM pass)
    M = xm.shape[0]

    # Tile selection:
    #  - user tm forced to a multiple of 128 (correctness: BlockSpec divisibility),
    #  - never larger than (8-aligned) M,
    #  - when M is big, cap so grid_m >= 2 (v7x megacore split + double buffering).
    tm = max(128, _round_up(tm, 128))
    m_aligned = _round_up(M, 8)
    if m_aligned <= 256:
        tm_eff = m_aligned                      # single small tile; splitting buys nothing
    else:
        tm_eff = min(tm, max(128, _round_up(pl.cdiv(m_aligned, 2), 128)))
    grid_m = pl.cdiv(M, tm_eff)

    # Tiny resident operands (one-off casts over ~2 KB; negligible).
    w1c = w1.astype(matmul_dtype)                      # (nx, nf)
    w2c = w2.astype(matmul_dtype)                      # (nf, nf)
    b1c = b1.reshape(1, nf).astype(jnp.float32)
    b2c = b2.reshape(1, nf).astype(jnp.float32)

    wbytes = jnp.dtype(matmul_dtype).itemsize
    cost = pl.CostEstimate(
        flops=2 * M * nx * nf + 2 * M * nf * nf,
        transcendentals=0,
        bytes_accessed=int(4 * M * nx + 4 * M * nf
                           + wbytes * (nx * nf + nf * nf) + 4 * 2 * nf),
    )

    resident = lambda shape: pl.BlockSpec(shape, lambda i: (0, 0))
    out = pl.pallas_call(
        deepconv1d_kernel,
        out_shape=jax.ShapeDtypeStruct((M, nf), jnp.float32),
        grid=(grid_m,),
        in_specs=[
            pl.BlockSpec((tm_eff, nx), lambda i: (i, 0)),   # x streams over M
            resident((nx, nf)),                             # w1 resident in VMEM
            resident((1, nf)),                              # b1
            resident((nf, nf)),                             # w2
            resident((1, nf)),                              # b2
        ],
        out_specs=pl.BlockSpec((tm_eff, nf), lambda i: (i, 0)),
        compiler_params=pltpu.CompilerParams(
            dimension_semantics=("parallel",),              # megacore split on v7x
            vmem_limit_bytes=32 * 1024 * 1024,              # raises v5e's 16 MiB default
        ),
        cost_estimate=cost,
    )(xm, w1c, b1c, w2c, b2c)

    return out.reshape(size_out).astype(x.dtype)


def deepconv1d_reference(x, w1, b1, w2, b2):
    nf = w1.shape[1]
    size_out = x.shape[:-1] + (nf,)
    xm = x.reshape(-1, x.shape[-1])
    h = xm @ w1 + b1
    y = jnp.maximum(h, 0.0) @ w2 + b2
    return (y + h).reshape(size_out)


if __name__ == "__main__":
    # Module config: nf = 32, rf = 1, nx = 32.  Input: (batch=2, seq=8, nx=32).
    nx, nf = 32, 32
    batch, seq = 2, 8

    key = jax.random.PRNGKey(0)
    kx, k1, k2 = jax.random.split(key, 3)

    # Deterministic synthetic parameters matching nn.init.normal_(std=0.02).
    w1 = jax.random.normal(k1, (nx, nf), dtype=jnp.float32) * 0.02
    b1 = jnp.zeros((nf,), dtype=jnp.float32)
    w2 = jax.random.normal(k2, (nf, nf), dtype=jnp.float32) * 0.02
    b2 = jnp.zeros((nf,), dtype=jnp.float32)

    x = jax.random.normal(kx, (batch, seq, nx), dtype=jnp.float32)

    ref = deepconv1d_reference(x, w1, b1, w2, b2)

    # Exact mode (f32 MXU inputs): tight tolerance.
    out_f32 = jax.block_until_ready(
        deepconv1d(x, w1, b1, w2, b2, matmul_dtype=jnp.float32))
    assert out_f32.shape == (batch, seq, nf)
    assert jnp.allclose(out_f32, ref, atol=1e-5, rtol=1e-5)

    # Fast mode (bf16 MXU inputs, f32 accumulation + epilogue): bf16 tolerance.
    out_bf16 = jax.block_until_ready(deepconv1d(x, w1, b1, w2, b2))
    assert out_bf16.shape == (batch, seq, nf)
    assert jnp.allclose(out_bf16, ref, atol=5e-3, rtol=5e-2)

    print("KERNEL_OK")
</pallas_src>

<mosaic_0001>
module attributes {stable_mosaic.version = 11 : i64} {
  func.func @deepconv1d_kernel(%arg0: i32, %arg1: memref<16x32xf32, #tpu.memory_space<vmem>>, %arg2: memref<32x32xf32, #tpu.memory_space<vmem>>, %arg3: memref<1x32xf32, #tpu.memory_space<vmem>>, %arg4: memref<32x32xf32, #tpu.memory_space<vmem>>, %arg5: memref<1x32xf32, #tpu.memory_space<vmem>>, %arg6: memref<16x32xf32, #tpu.memory_space<vmem>>) attributes {dimension_semantics = [#tpu.dimension_semantics<parallel>], iteration_bounds = array<i64: 1>, scalar_prefetch = 0 : i64, scratch_operands = 0 : i64, tpu.core_type = #tpu.core_type<tc>, window_params = [{transform_indices = @transform_0, window_bounds = array<i64: 16, 32>}, {pipeline_mode = #tpu.pipeline_mode<synchronous>, transform_indices = @transform_1, window_bounds = array<i64: 32, 32>}, {pipeline_mode = #tpu.pipeline_mode<synchronous>, transform_indices = @transform_2, window_bounds = array<i64: 1, 32>}, {pipeline_mode = #tpu.pipeline_mode<synchronous>, transform_indices = @transform_3, window_bounds = array<i64: 32, 32>}, {pipeline_mode = #tpu.pipeline_mode<synchronous>, transform_indices = @transform_4, window_bounds = array<i64: 1, 32>}, {transform_indices = @transform_5, window_bounds = array<i64: 16, 32>}]} {
    %c0 = arith.constant 0 : index
    %c0_0 = arith.constant 0 : index
    %0 = vector.load %arg1[%c0, %c0_0] : memref<16x32xf32, #tpu.memory_space<vmem>>, vector<16x32xf32>
    %c0_1 = arith.constant 0 : index
    %c0_2 = arith.constant 0 : index
    %1 = vector.load %arg2[%c0_1, %c0_2] : memref<32x32xf32, #tpu.memory_space<vmem>>, vector<32x32xf32>
    %cst = arith.constant dense<0.000000e+00> : vector<16x32xf32>
    %2 = tpu.matmul %0, %1, %cst {dimension_numbers = #tpu.dot_dimension_numbers<[1], [0], [0], [1], [0, 0, 1, 1], [], []>} : vector<16x32xf32>, vector<32x32xf32>, vector<16x32xf32> -> vector<16x32xf32>
    %c0_3 = arith.constant 0 : index
    %c0_4 = arith.constant 0 : index
    %3 = vector.load %arg3[%c0_3, %c0_4] : memref<1x32xf32, #tpu.memory_space<vmem>>, vector<1x32xf32>
    %4 = vector.broadcast %3 : vector<1x32xf32> to vector<16x32xf32>
    %5 = arith.addf %2, %4 : vector<16x32xf32>
    %cst_5 = arith.constant 0.000000e+00 : f32
    %6 = vector.broadcast %cst_5 : f32 to vector<16x32xf32>
    %7 = arith.maximumf %5, %6 : vector<16x32xf32>
    %c0_6 = arith.constant 0 : index
    %c0_7 = arith.constant 0 : index
    %8 = vector.load %arg4[%c0_6, %c0_7] : memref<32x32xf32, #tpu.memory_space<vmem>>, vector<32x32xf32>
    %cst_8 = arith.constant dense<0.000000e+00> : vector<16x32xf32>
    %9 = tpu.matmul %7, %8, %cst_8 {dimension_numbers = #tpu.dot_dimension_numbers<[1], [0], [0], [1], [0, 0, 1, 1], [], []>} : vector<16x32xf32>, vector<32x32xf32>, vector<16x32xf32> -> vector<16x32xf32>
    %c0_9 = arith.constant 0 : index
    %c0_10 = arith.constant 0 : index
    %10 = vector.load %arg5[%c0_9, %c0_10] : memref<1x32xf32, #tpu.memory_space<vmem>>, vector<1x32xf32>
    %11 = vector.broadcast %10 : vector<1x32xf32> to vector<16x32xf32>
    %12 = arith.addf %9, %11 : vector<16x32xf32>
    %13 = arith.addf %12, %5 : vector<16x32xf32>
    %c0_11 = arith.constant 0 : index
    %c0_12 = arith.constant 0 : index
    %14 = vector.load %arg6[%c0_11, %c0_12] : memref<16x32xf32, #tpu.memory_space<vmem>>, vector<16x32xf32>
    tpu.vector_store %arg6[%c0_11, %c0_12], %13 {strides = array<i32>} : memref<16x32xf32, #tpu.memory_space<vmem>>, vector<16x32xf32>,
    return
  }
  func.func @transform_0(%arg0: i32) -> (i32, i32) {
    %c0_i32 = arith.constant 0 : i32
    %c0_i32_0 = arith.constant 0 : i32
    return %arg0, %c0_i32 : i32, i32
  }
  func.func @transform_1(%arg0: i32) -> (i32, i32) {
    %c0_i32 = arith.constant 0 : i32
    %c0_i32_0 = arith.constant 0 : i32
    %c0_i32_1 = arith.constant 0 : i32
    return %c0_i32, %c0_i32_0 : i32, i32
  }
  func.func @transform_2(%arg0: i32) -> (i32, i32) {
    %c0_i32 = arith.constant 0 : i32
    %c0_i32_0 = arith.constant 0 : i32
    %c0_i32_1 = arith.constant 0 : i32
    return %c0_i32, %c0_i32_0 : i32, i32
  }
  func.func @transform_3(%arg0: i32) -> (i32, i32) {
    %c0_i32 = arith.constant 0 : i32
    %c0_i32_0 = arith.constant 0 : i32
    %c0_i32_1 = arith.constant 0 : i32
    return %c0_i32, %c0_i32_0 : i32, i32
  }
  func.func @transform_4(%arg0: i32) -> (i32, i32) {
    %c0_i32 = arith.constant 0 : i32
    %c0_i32_0 = arith.constant 0 : i32
    %c0_i32_1 = arith.constant 0 : i32
    return %c0_i32, %c0_i32_0 : i32, i32
  }
  func.func @transform_5(%arg0: i32) -> (i32, i32) {
    %c0_i32 = arith.constant 0 : i32
    %c0_i32_0 = arith.constant 0 : i32
    return %arg0, %c0_i32 : i32, i32
  }
}

</mosaic_0001>

<bundles_post_ra>
// kernel: tpu_custom_call.1
= control target key start
LH: loop header
LB: loop body
LE: loop exit
PB: predicated region body
PF: predicated region fallthrough
CT: control target
= control target key end

     0   :  { %10 = vsyncpa [#allocation3], 0  ;;  %s544_s0 = inlined_call_operand.hbm [shape: f32[16,32], index: 0, kind: input, shape index: {}]   ;;  %s545_s1 = inlined_call_operand.hbm [shape: f32[32,32], index: 1, kind: input, shape index: {}]   ;;  %s546_s2 = inlined_call_operand.vmem [shape: f32[1,32], index: 2, kind: input, shape index: {}]   ;;  %s547_s3 = inlined_call_operand.hbm [shape: f32[32,32], index: 3, kind: input, shape index: {}]   ;;  %s548_s4 = inlined_call_operand.vmem [shape: f32[1,32], index: 4, kind: input, shape index: {}]   ;;  %s549_s5 = inlined_call_operand.hbm [shape: f32[16,32], index: 5, kind: output, shape index: {}]  }
   0x1   :  { %11 = vsyncpa [#allocation6], 0 }
   0x2   :  { %12 = vsyncpa [#allocation4], 0  ;;  %s429_s18 = smov [#allocation5]   ;;  %s430_s20 = smov [#allocation2]  }
   0x3   :  { %s30_s19 = sshll.u32 %s429_s18, 4  ;;  %s18_s21 = sshll.u32 %s430_s20, 4  ;;  %s31_s19 = int_to_ptr.vmem [resolvable:$true] %s30_s19  ;;  %s465_s21 = int_to_ptr.vmem [resolvable:$true] %s18_s21 }
   0x4   :  { %s335_s24 = scalar_lea.hbm %s545_s1, 512 }
   0x5   :  { %p336_p0 = scmp.ne.s32.totalorder %s545_s1, %s335_s24  ;;  %p339_p1 = scmp.lt.u32.totalorder %s335_s24, %s545_s1 }
   0x7   :  { %p341_p2 = pnand %p339_p1, %p336_p0 }
   0x9   :  { %344 = shalt.err (!%p341_p2)
}
   0xa   :  { %s345_s29 = scalar_lea.vmem %s31_s19, 512  ;;  %p350_p4 = scmp.lt.s32.totalorder %s31_s19, %s31_s19 }
   0xb   :  { %p346_p3 = scmp.ne.s32.totalorder %s31_s19, %s345_s29  ;;  %p351_p5 = scmp.lt.s32.totalorder %s345_s29, %s345_s29 }
   0xd   :  { %p352_p6 = por %p351_p5, %p350_p4 }
   0xf   :  { %p353_p7 = pnand %p352_p6, %p346_p3 }
  0x11   :  { %356 = shalt.err (!%p353_p7)
}
  0x12   :  { %s431_s30 = smov 128   ;;  %s432_s6 = smov 8  }
  0x13   :  { %36 = dma.hbm_to_vmem [thread:$0]  %s545_s1, 512, %s31_s19, [#allocation6], %s431_s30, %s431_s30, %s432_s6  }
  0x14   :  { %s357_s11 = scalar_lea.hbm %s544_s0, 256 }
  0x15   :  { %p358_p8 = scmp.ne.s32.totalorder %s544_s0, %s357_s11  ;;  %p361_p9 = scmp.lt.u32.totalorder %s357_s11, %s544_s0 }
  0x17   :  { %p363_p10 = pnand %p361_p9, %p358_p8 }
  0x19   :  { %366 = shalt.err (!%p363_p10)
}
  0x1a   :  { %s367_s16 = scalar_lea.vmem %s465_s21, 256  ;;  %p372_p12 = scmp.lt.s32.totalorder %s465_s21, %s465_s21 }
  0x1b   :  { %p368_p11 = scmp.ne.s32.totalorder %s465_s21, %s367_s16  ;;  %p373_p13 = scmp.lt.s32.totalorder %s367_s16, %s367_s16 }
  0x1d   :  { %p374_p0 = por %p373_p13, %p372_p12 }
  0x1f   :  { %p375_p1 = pnand %p374_p0, %p368_p11 }
  0x21   :  { %378 = shalt.err (!%p375_p1)
}
  0x22   :  { %24 = dma.hbm_to_vmem [thread:$0]  %s544_s0, 256, %s465_s21, [#allocation3], %s431_s30, %s431_s30, %s432_s6  }
  0x23   :  { %s433_s18 = smov [#allocation7]   ;;  %s379_s23 = scalar_lea.hbm %s547_s3, 512 }
  0x24   :  { %s44_s19 = sshll.u32 %s433_s18, 4  ;;  %p380_p2 = scmp.ne.s32.totalorder %s547_s3, %s379_s23  ;;  %s45_s19 = int_to_ptr.vmem [resolvable:$true] %s44_s19 }
  0x25   :  { %p383_p3 = scmp.lt.u32.totalorder %s379_s23, %s547_s3 }
  0x27   :  { %p385_p4 = pnand %p383_p3, %p380_p2 }
  0x29   :  { %388 = shalt.err (!%p385_p4)
}
  0x2a   :  { %s389_s28 = scalar_lea.vmem %s45_s19, 512  ;;  %p394_p6 = scmp.lt.s32.totalorder %s45_s19, %s45_s19 }
  0x2b   :  { %p390_p5 = scmp.ne.s32.totalorder %s45_s19, %s389_s28  ;;  %p395_p7 = scmp.lt.s32.totalorder %s389_s28, %s389_s28 }
  0x2d   :  { %p396_p8 = por %p395_p7, %p394_p6 }
  0x2f   :  { %p397_p9 = pnand %p396_p8, %p390_p5 }
  0x31   :  { %400 = shalt.err (!%p397_p9)
}
  0x32   :  { %50 = dma.hbm_to_vmem [thread:$0]  %s547_s3, 512, %s45_s19, [#allocation6], %s431_s30, %s431_s30, %s432_s6  }
  0x33   :  { %423 = dma.done.wait [#allocation3], 256  }
  0x34   :  { %424 = vsyncadd [#allocation3], 4294967040 }
  0x35   :  { %425 = dma.done.wait [#allocation6], 1024  }
  0x36   :  { %426 = vsyncadd [#allocation6], 4294966272  ;;  %vm75_vm0 = vcmask 261120   ;;  %v64_v0 = vld [vmem:[#allocation5] sm:$0xff]  ;;  %v65_v1 = vld [vmem:[#allocation5 + $0x8] sm:$0xff]  ;;  %s434_s9 = smov [#allocation8]  }
  0x37   :  { %v66_v2 = vld [vmem:[#allocation5 + $0x10] sm:$0xff]  ;;  %v313_v3 = vpack.c.bf16 %v65_v1, %v64_v0  ;;  %v67_v4 = vld [vmem:[#allocation5 + $0x18] sm:$0xff]  ;;  %v159_v7 = vld [vmem:[#allocation7] sm:$0xff]  ;;  %s260_s10 = sshll.u32 %s434_s9, 4  ;;  %s261_s10 = int_to_ptr.vmem [resolvable:$true] %s260_s10 }
  0x38   :  { %v62_v5 = vld [vmem:[#allocation2] sm:$0xff]  ;;  %v317_v6 = vpack.c.bf16 %v67_v4, %v66_v2  ;;  %v160_v8 = vld [vmem:[#allocation7 + $0x8] sm:$0xff]  ;;  %v63_v10 = vld [vmem:[#allocation2 + $0x8] sm:$0xff]  ;;  %p406_p11 = scmp.lt.s32.totalorder %s261_s10, %s261_s10 }
  0x39   :  { %299 = vmatprep.mubr.msk.f32.mxu0 %vm75_vm0, %v62_v5  ;;  %314 = vmatprep.subr.bf16.mxu0 %v313_v3  ;;  %v321_v9 = vpack.c.bf16 %v160_v8, %v159_v7  ;;  %v161_v11 = vld [vmem:[#allocation7 + $0x10] sm:$0xff]  ;;  %v162_v12 = vld [vmem:[#allocation7 + $0x18] sm:$0xff] }
  0x3a   :  { %316 = vmatpush3.bf16.msra.mxu0 %v313_v3  ;;  %v325_v13 = vpack.c.bf16 %v162_v12, %v161_v11  ;;  %v273_v14 = vld [vmem:[%s546_s2] ss:$0 sm:$0xff]  ;;  %s401_s2 = scalar_lea.vmem %s261_s10, 256 }
  0x3b   :  { %318 = vmatprep.subr.bf16.mxu0 %v317_v6  ;;  %322 = vmatprep.subr.bf16.mxu1 %v321_v9  ;;  %v276_v21 = vld [vmem:[%s548_s4] ss:$0 sm:$0xff]  ;;  %p402_p10 = scmp.ne.s32.totalorder %s261_s10, %s401_s2  ;;  %p407_p12 = scmp.lt.s32.totalorder %s401_s2, %s401_s2 }
  0x3c   :  { %324 = vmatpush3.bf16.msra.mxu1 %v321_v9 }
  0x3d   :  { %326 = vmatprep.subr.bf16.mxu1 %v325_v13  ;;  %p408_p13 = por %p407_p12, %p406_p11 }
  0x3e   :  { %320 = vmatpush3.bf16.msra.mxu0 %v317_v6 }
  0x3f   :  { %p409_p0 = pnand %p408_p13, %p402_p10 }
  0x40   :  { %328 = vmatpush3.bf16.msra.mxu1 %v325_v13 }
  0x41   :  { %300 = vmatmul.mubr.msk.f32.vlgmr.msra.gmra.mrb[0].mxu0 %vm75_vm0, %v63_v10 }
 0x114   :  { %v301_v15 = vpop.f32.mrb[0].mxu0 }
 0x115   :  { %v154_v16 = vadd.f32 %v301_v15, %v273_v14  ;;  %v148_v17 = vpop.f32.mrb[1].mxu0 }
 0x116   :  { %v149_v18 = vadd.f32 %v273_v14, %v148_v17 }
 0x117   :  { %v158_v20 = vmax.f32 %v154_v16, 0.0 }
 0x118   :  { %v157_v19 = vmax.f32 %v149_v18, 0.0 }
 0x11a   :  { %310 = vmatprep.mubr.msk.f32.mxu1 %vm75_vm0, %v157_v19 }
 0x11b   :  { %311 = vmatmul.mubr.msk.f32.vlgmr.msra.gmra.mrb[0].mxu1 %vm75_vm0, %v158_v20 }
 0x1ee   :  { %v312_v22 = vpop.f32.mrb[0].mxu1 }
 0x1ef   :  { %v248_v23 = vadd.f32 %v312_v22, %v276_v21  ;;  %v242_v24 = vpop.f32.mrb[1].mxu1 }
 0x1f0   :  { %v243_v25 = vadd.f32 %v276_v21, %v242_v24 }
 0x1f1   :  { %v252_v26 = vadd.f32 %v248_v23, %v154_v16 }
 0x1f2   :  { %v251_v27 = vadd.f32 %v243_v25, %v149_v18 }
 0x1f3   :  { %254 = vst.msk [vmem:[#allocation8 + $0x8] sm:$0xff] %vm75_vm0, %v252_v26 }
 0x1f4   :  { %253 = vst.msk [vmem:[#allocation8] sm:$0xff] %vm75_vm0, %v251_v27 }
 0x1f5   :  { %412 = shalt.err (!%p409_p0)
}
 0x1f6   :  { %s413_s12 = scalar_lea.hbm %s549_s5, 256 }
 0x1f7   :  { %p414_p1 = scmp.ne.s32.totalorder %s549_s5, %s413_s12  ;;  %p417_p2 = scmp.lt.u32.totalorder %s413_s12, %s549_s5 }
 0x1f9   :  { %p419_p3 = pnand %p417_p2, %p414_p1 }
 0x1fb   :  { %422 = shalt.err (!%p419_p3)
}
 0x1fc   :  { %266 = dma.vmem_to_hbm [thread:$0]  %s261_s10, 256, %s549_s5, [#allocation4], %s431_s30, %s431_s30, %s432_s6  }
 0x1fd   :  { %427 = dma.done.wait [#allocation4], 256  }
 0x1fe   :  { %428 = vsyncadd [#allocation4], 4294967040 }
 0x1ff   :  { %270 = vsyncpa [#allocation3], 1 }
 0x200   :  { %271 = vsyncpa [#allocation6], 1 }
 0x201   :  { %272 = vsyncpa [#allocation4], 1 }

</bundles_post_ra>
